<compile_context>
chip_gen: v7x
topology: tpu7x:2x2x1
jax: 0.10.0
libtpu: 0.0.40
codegen_flags: <defaults>
</compile_context>

<pallas_src>
import math

import jax
import jax.numpy as jnp
from jax import lax
from jax.experimental import pallas as pl
from jax.experimental.pallas import tpu as pltpu

LANE = 128    # padded feature width of every hidden layer
STRIP = 128   # rows per inner strip -> (128,128) f32 intermediates = 16 vregs


def mlp_kernel(x_ref,
               w1_ref, b1_ref,
               w2_ref, b2_ref,
               w3_ref, b3_ref,
               w4t_ref, b4_ref,
               o_ref):
    # x_ref:   (TB, f_in)        one batch tile per grid step
    # wN_ref:  padded weights, resident in VMEM (constant index_map)
    # w4t_ref: (1, 128) bf16     the single output column, stored transposed
    # b4_ref:  (1, 128) f32      scalar bias replicated across lanes
    # o_ref:   (TB//STRIP, 128)  packed outputs: row s, lane c -> batch row s*128+c
    cdt = w1_ref.dtype                      # bf16 MXU operand dtype
    n_strips = x_ref.shape[0] // STRIP      # static

    def strip_body(s, carry):
        r0 = pl.multiple_of(s * STRIP, STRIP)
        xs = x_ref[pl.ds(r0, STRIP), :].astype(cdt)                     # (128, f_in)

        h = jnp.dot(xs, w1_ref[...], preferred_element_type=jnp.float32) + b1_ref[...]
        h = jnp.maximum(h, 0.0)
        h = jnp.dot(h.astype(cdt), w2_ref[...],
                    preferred_element_type=jnp.float32) + b2_ref[...]
        h = jnp.maximum(h, 0.0)
        h = jnp.dot(h.astype(cdt), w3_ref[...],
                    preferred_element_type=jnp.float32) + b3_ref[...]
        h = jnp.maximum(h, 0.0)                                         # (128, 128) f32

        # Last layer packed into lanes: (1,128) @ (128,128) -> (1,128) real outputs.
        ht = h.T.astype(cdt)                                            # one XLU transpose
        row = jnp.dot(w4t_ref[...], ht,
                      preferred_element_type=jnp.float32) + b4_ref[...]  # (1, 128)

        o_ref[pl.ds(s, 1), :] = row   # lane-dense, unmasked 128-wide store
        return carry

    lax.fori_loop(0, n_strips, strip_body, 0, unroll=True)


def mlp_forward(x, kernel_params, *, tile_batch=1024):
    (w1, b1), (w2, b2), (w3, b3), (w4t, b4) = kernel_params
    B, f_in = x.shape

    # Batch tile: multiple of STRIP(=128) -> satisfies the (8,128) block rule, keeps x
    # loads / output stores aligned, and amortizes per-grid-step overhead.
    tb = max(STRIP, (int(tile_batch) // STRIP) * STRIP)
    tb = min(tb, pl.cdiv(B, STRIP) * STRIP)
    # v7x megacore: prefer >= 2 grid steps so the "parallel" batch axis spans both TCs.
    if pl.cdiv(B, tb) == 1 and tb >= 2 * STRIP:
        tb = pl.cdiv(tb // 2, STRIP) * STRIP
    b_pad = pl.cdiv(B, tb) * tb
    if b_pad != B:
        x = jnp.pad(x, ((0, b_pad - B), (0, 0)))

    n_tiles = b_pad // tb
    rows_per_tile = tb // STRIP

    const_map = lambda i: (0, 0)           # weights/biases: resident across all steps
    full = lambda a: pl.BlockSpec(a.shape, const_map)

    out3d = pl.pallas_call(
        mlp_kernel,
        out_shape=jax.ShapeDtypeStruct((n_tiles, rows_per_tile, STRIP), jnp.float32),
        grid=(n_tiles,),
        in_specs=[
            pl.BlockSpec((tb, f_in), lambda i: (i, 0)),
            full(w1), full(b1),
            full(w2), full(b2),
            full(w3), full(b3),
            full(w4t), full(b4),
        ],
        # Leading grid dim squeezed out; kernel sees (rows_per_tile, 128).
        out_specs=pl.BlockSpec((None, rows_per_tile, STRIP), lambda i: (i, 0, 0)),
        compiler_params=pltpu.CompilerParams(
            dimension_semantics=("parallel",),   # megacore batch sharding on v7x
        ),
    )(x, w1, b1, w2, b2, w3, b3, w4t, b4)

    # Packed (n_tiles, rows, 128) -> flat batch order; drop padding; torch-like (B, 1).
    return out3d.reshape(-1)[:B].reshape(B, 1)


def init_net_params(key):
    # PyTorch nn.Linear default init: U(-1/sqrt(fan_in), 1/sqrt(fan_in)) for W and b.
    dims = [(10, 50), (50, 100), (100, 50), (50, 1)]
    params = []
    for k, (fi, fo) in zip(jax.random.split(key, len(dims)), dims):
        kw, kb = jax.random.split(k)
        bound = 1.0 / math.sqrt(fi)
        w = jax.random.uniform(kw, (fi, fo), jnp.float32, -bound, bound)
        b = jax.random.uniform(kb, (fo,), jnp.float32, -bound, bound)
        params.append((w, b))
    return params


def pack_params(f32_params, *, w_dtype=jnp.bfloat16):
    # Pad features to 128 lanes, cast weights to bf16, keep biases f32.
    # NOTE: bf16 weights give ~1e-2-level relative error vs an exact f32 nn.Linear stack.
    (w1, b1), (w2, b2), (w3, b3), (w4, b4) = f32_params

    def padw(w, pad_in, pad_out):
        return jnp.pad(w, ((0, pad_in - w.shape[0]),
                           (0, pad_out - w.shape[1]))).astype(w_dtype)

    def padb(b, pad_out):
        return jnp.pad(b.reshape(1, -1), ((0, 0), (0, pad_out - b.shape[0])))

    packed = [
        (padw(w1, 10, LANE), padb(b1, LANE)),
        (padw(w2, LANE, LANE), padb(b2, LANE)),
        (padw(w3, LANE, LANE), padb(b3, LANE)),
    ]
    # Layer 4: single output column stored as a (1,128) row; scalar bias replicated.
    w4t = jnp.pad(w4.T, ((0, 0), (0, LANE - w4.shape[0]))).astype(w_dtype)
    b4r = jnp.full((1, LANE), b4[0], jnp.float32)
    packed.append((w4t, b4r))
    return packed


def mlp_reference_packed(x, kernel_params):
    # Pure-JAX reference using the exact same packed bf16 params as the kernel.
    (w1, b1), (w2, b2), (w3, b3), (w4t, b4) = kernel_params
    cdt = w1.dtype
    h = x
    for w, b in ((w1, b1), (w2, b2), (w3, b3)):
        h = jnp.dot(h.astype(cdt), w, preferred_element_type=jnp.float32) + b
        h = jnp.maximum(h, 0.0)
    out = jnp.dot(h.astype(cdt), w4t.T, preferred_element_type=jnp.float32) + b4[0, 0]
    return out


def mlp_reference_f32(x, f32_params):
    # Faithful f32 version of the torch Net (un-padded weights).
    h = x
    for i, (w, b) in enumerate(f32_params):
        h = h @ w + b
        if i < len(f32_params) - 1:
            h = jnp.maximum(h, 0.0)
    return h


if __name__ == "__main__":
    key = jax.random.PRNGKey(0)
    kx, kp = jax.random.split(key)

    batch = 128
    x = jax.random.normal(kx, (batch, 10), jnp.float32)

    f32_params = init_net_params(kp)
    kparams = pack_params(f32_params)

    out = mlp_forward(x, kparams, tile_batch=1024)
    out = jax.block_until_ready(out)
    assert out.shape == (batch, 1)

    # Exact check vs pure JAX with the same packed bf16 params (validates the kernel).
    ref_packed = mlp_reference_packed(x, kparams)
    assert jnp.allclose(out, ref_packed, atol=1e-3, rtol=1e-3), \
        float(jnp.max(jnp.abs(out - ref_packed)))

    # Parity check vs the true f32 torch-style Net (bf16 weights -> small, bounded error).
    ref_f32 = mlp_reference_f32(x, f32_params)
    assert jnp.allclose(out, ref_f32, atol=3e-2, rtol=3e-2), \
        float(jnp.max(jnp.abs(out - ref_f32)))

    print("KERNEL_OK")
</pallas_src>

<mosaic_0001>
module attributes {stable_mosaic.version = 11 : i64} {
  func.func @mlp_kernel(%arg0: i32, %arg1: memref<128x10xf32, #tpu.memory_space<vmem>>, %arg2: memref<10x128xbf16, #tpu.memory_space<vmem>>, %arg3: memref<1x128xf32, #tpu.memory_space<vmem>>, %arg4: memref<128x128xbf16, #tpu.memory_space<vmem>>, %arg5: memref<1x128xf32, #tpu.memory_space<vmem>>, %arg6: memref<128x128xbf16, #tpu.memory_space<vmem>>, %arg7: memref<1x128xf32, #tpu.memory_space<vmem>>, %arg8: memref<1x128xbf16, #tpu.memory_space<vmem>>, %arg9: memref<1x128xf32, #tpu.memory_space<vmem>>, %arg10: memref<1x1x128xf32, #tpu.memory_space<vmem>>) attributes {dimension_semantics = [#tpu.dimension_semantics<parallel>], iteration_bounds = array<i64: 1>, scalar_prefetch = 0 : i64, scratch_operands = 0 : i64, tpu.core_type = #tpu.core_type<tc>, window_params = [{transform_indices = @transform_0, window_bounds = array<i64: 128, 10>}, {pipeline_mode = #tpu.pipeline_mode<synchronous>, transform_indices = @transform_1, window_bounds = array<i64: 10, 128>}, {pipeline_mode = #tpu.pipeline_mode<synchronous>, transform_indices = @transform_2, window_bounds = array<i64: 1, 128>}, {pipeline_mode = #tpu.pipeline_mode<synchronous>, transform_indices = @transform_3, window_bounds = array<i64: 128, 128>}, {pipeline_mode = #tpu.pipeline_mode<synchronous>, transform_indices = @transform_4, window_bounds = array<i64: 1, 128>}, {pipeline_mode = #tpu.pipeline_mode<synchronous>, transform_indices = @transform_5, window_bounds = array<i64: 128, 128>}, {pipeline_mode = #tpu.pipeline_mode<synchronous>, transform_indices = @transform_6, window_bounds = array<i64: 1, 128>}, {pipeline_mode = #tpu.pipeline_mode<synchronous>, transform_indices = @transform_7, window_bounds = array<i64: 1, 128>}, {pipeline_mode = #tpu.pipeline_mode<synchronous>, transform_indices = @transform_8, window_bounds = array<i64: 1, 128>}, {transform_indices = @transform_9, window_bounds = array<i64: 1, 1, 128>}]} {
    %c0_i32 = arith.constant 0 : i32
    %c128_i32 = arith.constant 128 : i32
    %0 = arith.muli %c0_i32, %c128_i32 : i32
    %1 = tpu.assume_multiple %0, 128 : i32
    %2 = arith.index_cast %1 : i32 to index
    %c0 = arith.constant 0 : index
    %3 = vector.load %arg1[%2, %c0] : memref<128x10xf32, #tpu.memory_space<vmem>>, vector<128x10xf32>
    %4 = arith.truncf %3 : vector<128x10xf32> to vector<128x10xbf16>
    %c0_0 = arith.constant 0 : index
    %c0_1 = arith.constant 0 : index
    %5 = vector.load %arg2[%c0_0, %c0_1] : memref<10x128xbf16, #tpu.memory_space<vmem>>, vector<10x128xbf16>
    %cst = arith.constant dense<0.000000e+00> : vector<128x128xf32>
    %6 = tpu.matmul %4, %5, %cst {dimension_numbers = #tpu.dot_dimension_numbers<[1], [0], [0], [1], [0, 0, 1, 1], [], []>} : vector<128x10xbf16>, vector<10x128xbf16>, vector<128x128xf32> -> vector<128x128xf32>
    %c0_2 = arith.constant 0 : index
    %c0_3 = arith.constant 0 : index
    %7 = vector.load %arg3[%c0_2, %c0_3] : memref<1x128xf32, #tpu.memory_space<vmem>>, vector<1x128xf32>
    %8 = vector.broadcast %7 : vector<1x128xf32> to vector<128x128xf32>
    %9 = arith.addf %6, %8 : vector<128x128xf32>
    %cst_4 = arith.constant 0.000000e+00 : f32
    %10 = vector.broadcast %cst_4 : f32 to vector<128x128xf32>
    %11 = arith.maximumf %9, %10 : vector<128x128xf32>
    %12 = arith.truncf %11 : vector<128x128xf32> to vector<128x128xbf16>
    %c0_5 = arith.constant 0 : index
    %c0_6 = arith.constant 0 : index
    %13 = vector.load %arg4[%c0_5, %c0_6] : memref<128x128xbf16, #tpu.memory_space<vmem>>, vector<128x128xbf16>
    %cst_7 = arith.constant dense<0.000000e+00> : vector<128x128xf32>
    %14 = tpu.matmul %12, %13, %cst_7 {dimension_numbers = #tpu.dot_dimension_numbers<[1], [0], [0], [1], [0, 0, 1, 1], [], []>} : vector<128x128xbf16>, vector<128x128xbf16>, vector<128x128xf32> -> vector<128x128xf32>
    %c0_8 = arith.constant 0 : index
    %c0_9 = arith.constant 0 : index
    %15 = vector.load %arg5[%c0_8, %c0_9] : memref<1x128xf32, #tpu.memory_space<vmem>>, vector<1x128xf32>
    %16 = vector.broadcast %15 : vector<1x128xf32> to vector<128x128xf32>
    %17 = arith.addf %14, %16 : vector<128x128xf32>
    %cst_10 = arith.constant 0.000000e+00 : f32
    %18 = vector.broadcast %cst_10 : f32 to vector<128x128xf32>
    %19 = arith.maximumf %17, %18 : vector<128x128xf32>
    %20 = arith.truncf %19 : vector<128x128xf32> to vector<128x128xbf16>
    %c0_11 = arith.constant 0 : index
    %c0_12 = arith.constant 0 : index
    %21 = vector.load %arg6[%c0_11, %c0_12] : memref<128x128xbf16, #tpu.memory_space<vmem>>, vector<128x128xbf16>
    %cst_13 = arith.constant dense<0.000000e+00> : vector<128x128xf32>
    %22 = tpu.matmul %20, %21, %cst_13 {dimension_numbers = #tpu.dot_dimension_numbers<[1], [0], [0], [1], [0, 0, 1, 1], [], []>} : vector<128x128xbf16>, vector<128x128xbf16>, vector<128x128xf32> -> vector<128x128xf32>
    %c0_14 = arith.constant 0 : index
    %c0_15 = arith.constant 0 : index
    %23 = vector.load %arg7[%c0_14, %c0_15] : memref<1x128xf32, #tpu.memory_space<vmem>>, vector<1x128xf32>
    %24 = vector.broadcast %23 : vector<1x128xf32> to vector<128x128xf32>
    %25 = arith.addf %22, %24 : vector<128x128xf32>
    %cst_16 = arith.constant 0.000000e+00 : f32
    %26 = vector.broadcast %cst_16 : f32 to vector<128x128xf32>
    %27 = arith.maximumf %25, %26 : vector<128x128xf32>
    %28 = tpu.transpose %27, [1, 0] : vector<128x128xf32> -> vector<128x128xf32>
    %29 = arith.truncf %28 : vector<128x128xf32> to vector<128x128xbf16>
    %c0_17 = arith.constant 0 : index
    %c0_18 = arith.constant 0 : index
    %30 = vector.load %arg8[%c0_17, %c0_18] : memref<1x128xbf16, #tpu.memory_space<vmem>>, vector<1x128xbf16>
    %cst_19 = arith.constant dense<0.000000e+00> : vector<1x128xf32>
    %31 = tpu.matmul %30, %29, %cst_19 {dimension_numbers = #tpu.dot_dimension_numbers<[1], [0], [0], [1], [0, 0, 1, 1], [], []>} : vector<1x128xbf16>, vector<128x128xbf16>, vector<1x128xf32> -> vector<1x128xf32>
    %c0_20 = arith.constant 0 : index
    %c0_21 = arith.constant 0 : index
    %32 = vector.load %arg9[%c0_20, %c0_21] : memref<1x128xf32, #tpu.memory_space<vmem>>, vector<1x128xf32>
    %33 = arith.addf %31, %32 : vector<1x128xf32>
    %c0_22 = arith.constant 0 : index
    %34 = arith.index_cast %c0_i32 : i32 to index
    %c0_23 = arith.constant 0 : index
    %35 = vector.load %arg10[%c0_22, %34, %c0_23] : memref<1x1x128xf32, #tpu.memory_space<vmem>>, vector<1x1x128xf32>
    %36 = vector.shape_cast %35 : vector<1x1x128xf32> to vector<1x128xf32>
    %37 = vector.shape_cast %33 : vector<1x128xf32> to vector<1x1x128xf32>
    tpu.vector_store %arg10[%c0_22, %34, %c0_23], %37 {strides = array<i32>} : memref<1x1x128xf32, #tpu.memory_space<vmem>>, vector<1x1x128xf32>,
    %c1_i32 = arith.constant 1 : i32
    return
  }
  func.func @transform_0(%arg0: i32) -> (i32, i32) {
    %c0_i32 = arith.constant 0 : i32
    %c0_i32_0 = arith.constant 0 : i32
    return %arg0, %c0_i32 : i32, i32
  }
  func.func @transform_1(%arg0: i32) -> (i32, i32) {
    %c0_i32 = arith.constant 0 : i32
    %c0_i32_0 = arith.constant 0 : i32
    %c0_i32_1 = arith.constant 0 : i32
    return %c0_i32, %c0_i32_0 : i32, i32
  }
  func.func @transform_2(%arg0: i32) -> (i32, i32) {
    %c0_i32 = arith.constant 0 : i32
    %c0_i32_0 = arith.constant 0 : i32
    %c0_i32_1 = arith.constant 0 : i32
    return %c0_i32, %c0_i32_0 : i32, i32
  }
  func.func @transform_3(%arg0: i32) -> (i32, i32) {
    %c0_i32 = arith.constant 0 : i32
    %c0_i32_0 = arith.constant 0 : i32
    %c0_i32_1 = arith.constant 0 : i32
    return %c0_i32, %c0_i32_0 : i32, i32
  }
  func.func @transform_4(%arg0: i32) -> (i32, i32) {
    %c0_i32 = arith.constant 0 : i32
    %c0_i32_0 = arith.constant 0 : i32
    %c0_i32_1 = arith.constant 0 : i32
    return %c0_i32, %c0_i32_0 : i32, i32
  }
  func.func @transform_5(%arg0: i32) -> (i32, i32) {
    %c0_i32 = arith.constant 0 : i32
    %c0_i32_0 = arith.constant 0 : i32
    %c0_i32_1 = arith.constant 0 : i32
    return %c0_i32, %c0_i32_0 : i32, i32
  }
  func.func @transform_6(%arg0: i32) -> (i32, i32) {
    %c0_i32 = arith.constant 0 : i32
    %c0_i32_0 = arith.constant 0 : i32
    %c0_i32_1 = arith.constant 0 : i32
    return %c0_i32, %c0_i32_0 : i32, i32
  }
  func.func @transform_7(%arg0: i32) -> (i32, i32) {
    %c0_i32 = arith.constant 0 : i32
    %c0_i32_0 = arith.constant 0 : i32
    %c0_i32_1 = arith.constant 0 : i32
    return %c0_i32, %c0_i32_0 : i32, i32
  }
  func.func @transform_8(%arg0: i32) -> (i32, i32) {
    %c0_i32 = arith.constant 0 : i32
    %c0_i32_0 = arith.constant 0 : i32
    %c0_i32_1 = arith.constant 0 : i32
    return %c0_i32, %c0_i32_0 : i32, i32
  }
  func.func @transform_9(%arg0: i32) -> (i32, i32, i32) {
    %c0_i32 = arith.constant 0 : i32
    %c0_i32_0 = arith.constant 0 : i32
    %c0_i32_1 = arith.constant 0 : i32
    return %arg0, %c0_i32, %c0_i32_0 : i32, i32, i32
  }
}

</mosaic_0001>

<bundles_post_ra>
// kernel: tpu_custom_call.1
= control target key start
LH: loop header
LB: loop body
LE: loop exit
PB: predicated region body
PF: predicated region fallthrough
CT: control target
= control target key end

     0   :  { %vm97_vm0 = vcmask 1044480   ;;  %vm72_vm1 = vcmask 80896   ;;  %s1134_s0 = inlined_call_operand.vmem [shape: f32[128,10], index: 0, kind: input, shape index: {}]   ;;  %s1135_s1 = inlined_call_operand.vmem [shape: bf16[10,128], index: 1, kind: input, shape index: {}]   ;;  %s1136_s2 = inlined_call_operand.vmem [shape: f32[1,128], index: 2, kind: input, shape index: {}]   ;;  %s1137_s3 = inlined_call_operand.vmem [shape: bf16[128,128], index: 3, kind: input, shape index: {}]   ;;  %s1138_s4 = inlined_call_operand.vmem [shape: f32[1,128], index: 4, kind: input, shape index: {}]   ;;  %s1139_s5 = inlined_call_operand.vmem [shape: bf16[128,128], index: 5, kind: input, shape index: {}]   ;;  %s1140_s6 = inlined_call_operand.vmem [shape: f32[1,128], index: 6, kind: input, shape index: {}]   ;;  %s1141_s7 = inlined_call_operand.vmem [shape: bf16[1,128], index: 7, kind: input, shape index: {}]   ;;  %s1142_s8 = inlined_call_operand.vmem [shape: f32[1,128], index: 8, kind: input, shape index: {}]   ;;  %s1143_s9 = inlined_call_operand.hbm [shape: f32[1,1,128], index: 9, kind: output, shape index: {}]  }
   0x1   :  { %v879_v0 = vld [vmem:[%s1135_s1] sm:$0x1f]   ;;  %v35_v2 = vld [vmem:[%s1134_s0 + $0x8] sm:$0xff]  ;;  %v36_v3 = vld [vmem:[%s1134_s0 + $0x10] sm:$0xff] }
   0x2   :  { %v34_v1 = vld [vmem:[%s1134_s0] sm:$0xff]  ;;  %875 = vmatprep.subr.msk.bf16.mxu0 %vm97_vm0, %v879_v0  ;;  %v99_v4 = vsel %vm97_vm0, %v879_v0, 0  ;;  %v37_v6 = vld [vmem:[%s1134_s0 + $0x18] sm:$0xff]  ;;  %v39_v8 = vld [vmem:[%s1134_s0 + $0x28] sm:$0xff] }
   0x3   :  { %v50_v5 = vpack.c.bf16 %v35_v2, %v34_v1  ;;  %v38_v7 = vld [vmem:[%s1134_s0 + $0x20] sm:$0xff]  ;;  %774 = vmatpush3.bf16.msra.mxu0 %v99_v4  ;;  %v51_v9 = vpack.c.bf16 %v37_v6, %v36_v3  ;;  %v40_v11 = vld [vmem:[%s1134_s0 + $0x30] sm:$0xff]  ;;  %v41_v12 = vld [vmem:[%s1134_s0 + $0x38] sm:$0xff] }
   0x4   :  { %v52_v10 = vpack.c.bf16 %v39_v8, %v38_v7  ;;  %v42_v13 = vld [vmem:[%s1134_s0 + $0x40] sm:$0xff]  ;;  %v43_v14 = vld [vmem:[%s1134_s0 + $0x48] sm:$0xff]  ;;  %v53_v17 = vpack.c.bf16 %v41_v12, %v40_v11  ;;  %v882_v19 = vld [vmem:[%s1137_s3 + $0x10] sm:$0xff]  }
   0x5   :  { %775 = vmatprep.mubr.msk.bf16.mxu0 %vm72_vm1, %v50_v5  ;;  %v880_v15 = vld [vmem:[%s1137_s3] sm:$0xff]   ;;  %v881_v16 = vld [vmem:[%s1137_s3 + $0x8] sm:$0xff]   ;;  %v54_v18 = vpack.c.bf16 %v43_v14, %v42_v13  ;;  %v44_v20 = vld [vmem:[%s1134_s0 + $0x50] sm:$0xff] }
   0x6   :  { %776 = vmatmul.mubr.msk.bf16.vlgmr.msra.gmra.mrb[0].mxu0 %vm72_vm1, %v51_v9  ;;  %791 = vmatprep.subr.bf16.mxu1 %v880_v15  ;;  %v45_v21 = vld [vmem:[%s1134_s0 + $0x58] sm:$0xff]  ;;  %v46_v23 = vld [vmem:[%s1134_s0 + $0x60] sm:$0xff]  ;;  %v47_v24 = vld [vmem:[%s1134_s0 + $0x68] sm:$0xff] }
   0x7   :  { %779 = vmatprep.mubr.msk.bf16.mxu0 %vm72_vm1, %v52_v10  ;;  %792 = vmatpush3.bf16.msra.mxu1 %v880_v15  ;;  %v883_v22 = vld [vmem:[%s1137_s3 + $0x18] sm:$0xff]   ;;  %v55_v25 = vpack.c.bf16 %v45_v21, %v44_v20  ;;  %v56_v26 = vpack.c.bf16 %v47_v24, %v46_v23  ;;  %v884_v27 = vld [vmem:[%s1137_s3 + $0x20] sm:$0xff]  }
   0x8   :  { %793 = vmatprep.subr.bf16.mxu1 %v881_v16 }
   0xb   :  { %794 = vmatpush3.bf16.msra.mxu1 %v881_v16 }
   0xc   :  { %795 = vmatprep.subr.bf16.mxu1 %v882_v19 }
   0xe   :  { %780 = vmatmul.mubr.msk.bf16.gmra.mrb[4].mxu0 %vm72_vm1, %v53_v17 }
   0xf   :  { %783 = vmatprep.mubr.msk.bf16.mxu0 %vm72_vm1, %v54_v18  ;;  %796 = vmatpush3.bf16.msra.mxu1 %v882_v19 }
  0x10   :  { %797 = vmatprep.subr.bf16.mxu1 %v883_v22 }
  0x11   :  { %14 = vsyncpa [#allocation3], 0  ;;  %v48_v28 = vld [vmem:[%s1134_s0 + $0x70] sm:$0xff]  ;;  %v49_v29 = vld [vmem:[%s1134_s0 + $0x78] sm:$0xff]  ;;  %vm921_vm2 = vmmov 0   ;;  %s922_s13 = smov [#allocation2]  }
  0x12   :  { %v885_v30 = vld [vmem:[%s1137_s3 + $0x28] sm:$0xff]   ;;  %v57_v31 = vpack.c.bf16 %v49_v29, %v48_v28  ;;  %v886_v32 = vld [vmem:[%s1137_s3 + $0x30] sm:$0xff]   ;;  %v887_v33 = vld [vmem:[%s1137_s3 + $0x38] sm:$0xff]   ;;  %s687_s14 = sshll.u32 %s922_s13, 4  ;;  %s688_s14 = int_to_ptr.vmem [resolvable:$true] %s687_s14 }
  0x13   :  { %798 = vmatpush3.bf16.msra.mxu1 %v883_v22  ;;  %v888_v34 = vld [vmem:[%s1139_s5] sm:$0xff]   ;;  %v889_v35 = vld [vmem:[%s1139_s5 + $0x8] sm:$0xff]   ;;  %v890_v36 = vld [vmem:[%s1139_s5 + $0x10] sm:$0xff]   ;;  %s896_s0 = scalar_lea.vmem %s688_s14, 16  ;;  %s900_s15 = scalar_lea.vmem %s688_s14, 32 }
  0x14   :  { %799 = vmatprep.subr.bf16.mxu1 %v884_v27  ;;  %823 = vmatprep.subr.bf16.mxu0 %v888_v34  ;;  %v891_v37 = vld [vmem:[%s1139_s5 + $0x18] sm:$0xff]   ;;  %v892_v38 = vld [vmem:[%s1139_s5 + $0x20] sm:$0xff]   ;;  %v893_v39 = vld [vmem:[%s1139_s5 + $0x28] sm:$0xff]   ;;  %p897_p0 = scmp.ne.s32.totalorder %s688_s14, %s896_s0  ;;  %p901_p1 = scmp.lt.s32.totalorder %s688_s14, %s688_s14 }
  0x15   :  { %824 = vmatpush3.bf16.msra.mxu0 %v888_v34  ;;  %v695_v40 = vld [vmem:[%s1136_s2] ss:$0 sm:$0xff]  ;;  %v895_v34 = vld [vmem:[%s1139_s5 + $0x38] sm:$0xff]   ;;  %p902_p2 = scmp.lt.s32.totalorder %s900_s15, %s896_s0 }
  0x16   :  { %784 = vmatmul.mubr.msk.bf16.gmra.mrb[8].mxu0 %vm72_vm1, %v55_v25  ;;  %825 = vmatprep.subr.bf16.mxu0 %v889_v35 }
  0x17   :  { %787 = vmatprep.mubr.msk.bf16.mxu0 %vm72_vm1, %v56_v26  ;;  %800 = vmatpush3.bf16.msra.mxu1 %v884_v27  ;;  %p903_p3 = por %p902_p2, %p901_p1 }
  0x18   :  { %801 = vmatprep.subr.bf16.mxu1 %v885_v30 }
  0x19   :  { %826 = vmatpush3.bf16.msra.mxu0 %v889_v35  ;;  %v705_v35 = vld [vmem:[%s1138_s4] ss:$0 sm:$0xff]  ;;  %p904_p4 = pnand %p903_p3, %p897_p0 }
  0x1a   :  { %827 = vmatprep.subr.bf16.mxu0 %v890_v36 }
  0x1b   :  { %802 = vmatpush3.bf16.msra.mxu1 %v885_v30 }
  0x1c   :  { %803 = vmatprep.subr.bf16.mxu1 %v886_v32 }
  0x1d   :  { %828 = vmatpush3.bf16.msra.mxu0 %v890_v36 }
  0x1e   :  { %788 = vmatmul.mubr.msk.bf16.gmra.mrb[12].mxu0 %vm72_vm1, %v57_v31  ;;  %829 = vmatprep.subr.bf16.mxu0 %v891_v37 }
  0x1f   :  { %804 = vmatpush3.bf16.msra.mxu1 %v886_v32 }
  0x20   :  { %805 = vmatprep.subr.bf16.mxu1 %v887_v33 }
  0x21   :  { %830 = vmatpush3.bf16.msra.mxu0 %v891_v37 }
  0x22   :  { %831 = vmatprep.subr.bf16.mxu0 %v892_v38 }
  0x23   :  { %806 = vmatpush3.bf16.msra.mxu1 %v887_v33  ;;  %v894_v33 = vld [vmem:[%s1139_s5 + $0x30] sm:$0xff]  }
  0x25   :  { %832 = vmatpush3.bf16.msra.mxu0 %v892_v38 }
  0x26   :  { %833 = vmatprep.subr.bf16.mxu0 %v893_v39 }
  0x29   :  { %834 = vmatpush3.bf16.msra.mxu0 %v893_v39 }
  0x2a   :  { %835 = vmatprep.subr.bf16.mxu0 %v894_v33 }
  0x2d   :  { %836 = vmatpush3.bf16.msra.mxu0 %v894_v33 }
  0x2e   :  { %837 = vmatprep.subr.bf16.mxu0 %v895_v34 }
  0x31   :  { %838 = vmatpush3.bf16.msra.mxu0 %v895_v34 }
  0xd9   :  { %v777_v41 = vpop.f32.mrb[0].mxu0 }
  0xda   :  { %v144_v42 = vadd.f32 %v777_v41, %v695_v40  ;;  %v135_v43 = vpop.f32.mrb[1].mxu0 }
  0xdb   :  { %v136_v44 = vadd.f32 %v695_v40, %v135_v43  ;;  %v778_v45 = vpop.f32.mrb[2].mxu0 }
  0xdc   :  { %v147_v46 = vadd.f32 %v778_v45, %v695_v40  ;;  %v138_v47 = vpop.f32.mrb[3].mxu0  ;;  %v200_v49 = vmax.f32 %v144_v42, 0.0 }
  0xdd   :  { %v139_v48 = vadd.f32 %v695_v40, %v138_v47  ;;  %v198_v51 = vmax.f32 %v136_v44, 0.0 }
  0xde   :  { %v201_v50 = vmax.f32 %v147_v46, 0.0 }
  0xdf   :  { %v199_v52 = vmax.f32 %v139_v48, 0.0 }
  0xe0   :  { %v215_v53 = vpack.c.bf16 %v201_v50, %v200_v49 }
  0xe1   :  { %v781_v54 = vpop.f32.mrb[4].mxu0  ;;  %v214_v55 = vpack.c.bf16 %v199_v52, %v198_v51 }
  0xe2   :  { %v160_v56 = vadd.f32 %v781_v54, %v695_v40  ;;  %v151_v57 = vpop.f32.mrb[5].mxu0 }
  0xe3   :  { %v152_v58 = vadd.f32 %v695_v40, %v151_v57  ;;  %v782_v59 = vpop.f32.mrb[6].mxu0  ;;  %807 = vmatprep.mubr.bf16.mxu1 %v214_v55 }
  0xe4   :  { %v204_v60 = vmax.f32 %v160_v56, 0.0  ;;  %v163_v61 = vadd.f32 %v782_v59, %v695_v40  ;;  %v154_v62 = vpop.f32.mrb[7].mxu0  ;;  %808 = vmatmul.mubr.bf16.vlgmr.msra.gmra.mrb[0].mxu1 %v215_v53 }
  0xe5   :  { %v202_v63 = vmax.f32 %v152_v58, 0.0  ;;  %v155_v0 = vadd.f32 %v695_v40, %v154_v62 }
  0xe6   :  { %v205_v1 = vmax.f32 %v163_v61, 0.0 }
  0xe7   :  { %v203_v2 = vmax.f32 %v155_v0, 0.0 }
  0xe8   :  { %v217_v3 = vpack.c.bf16 %v205_v1, %v204_v60 }
  0xe9   :  { %v216_v4 = vpack.c.bf16 %v203_v2, %v202_v63  ;;  %v785_v5 = vpop.f32.mrb[8].mxu0 }
  0xea   :  { %v176_v6 = vadd.f32 %v785_v5, %v695_v40  ;;  %v167_v7 = vpop.f32.mrb[9].mxu0 }
  0xeb   :  { %811 = vmatprep.mubr.bf16.mxu1 %v216_v4  ;;  %v168_v8 = vadd.f32 %v695_v40, %v167_v7  ;;  %v786_v9 = vpop.f32.mrb[10].mxu0 }
  0xec   :  { %812 = vmatmul.mubr.bf16.gmra.mrb[4].mxu1 %v217_v3  ;;  %v208_v10 = vmax.f32 %v176_v6, 0.0  ;;  %v179_v11 = vadd.f32 %v786_v9, %v695_v40  ;;  %v170_v12 = vpop.f32.mrb[11].mxu0 }
  0xed   :  { %v206_v13 = vmax.f32 %v168_v8, 0.0  ;;  %v171_v14 = vadd.f32 %v695_v40, %v170_v12 }
  0xee   :  { %v209_v15 = vmax.f32 %v179_v11, 0.0 }
  0xef   :  { %v207_v16 = vmax.f32 %v171_v14, 0.0 }
  0xf0   :  { %v219_v17 = vpack.c.bf16 %v209_v15, %v208_v10 }
  0xf1   :  { %v218_v18 = vpack.c.bf16 %v207_v16, %v206_v13  ;;  %v789_v19 = vpop.f32.mrb[12].mxu0 }
  0xf2   :  { %v192_v20 = vadd.f32 %v789_v19, %v695_v40  ;;  %v183_v21 = vpop.f32.mrb[13].mxu0 }
  0xf3   :  { %815 = vmatprep.mubr.bf16.mxu1 %v218_v18  ;;  %v184_v22 = vadd.f32 %v695_v40, %v183_v21  ;;  %v790_v23 = vpop.f32.mrb[14].mxu0 }
  0xf4   :  { %816 = vmatmul.mubr.bf16.gmra.mrb[8].mxu1 %v219_v17  ;;  %v212_v24 = vmax.f32 %v192_v20, 0.0  ;;  %v195_v25 = vadd.f32 %v790_v23, %v695_v40  ;;  %v186_v26 = vpop.f32.mrb[15].mxu0 }
  0xf5   :  { %v210_v27 = vmax.f32 %v184_v22, 0.0  ;;  %v187_v28 = vadd.f32 %v695_v40, %v186_v26 }
  0xf6   :  { %v213_v29 = vmax.f32 %v195_v25, 0.0 }
  0xf7   :  { %v211_v30 = vmax.f32 %v187_v28, 0.0  ;;  %v1089_v28 = vld [vmem:[%s1140_s6] ss:$0 sm:$0xff] }
  0xf8   :  { %v221_v31 = vpack.c.bf16 %v213_v29, %v212_v24 }
  0xf9   :  { %v220_v32 = vpack.c.bf16 %v211_v30, %v210_v27 }
  0xfb   :  { %819 = vmatprep.mubr.bf16.mxu1 %v220_v32 }
  0xfc   :  { %820 = vmatmul.mubr.bf16.gmra.mrb[12].mxu1 %v221_v31 }
 0x1b7   :  { %v809_v36 = vpop.f32.mrb[0].mxu1 }
 0x1b8   :  { %v336_v37 = vadd.f32 %v809_v36, %v705_v35  ;;  %v327_v38 = vpop.f32.mrb[1].mxu1 }
 0x1b9   :  { %v328_v39 = vadd.f32 %v705_v35, %v327_v38  ;;  %v810_v40 = vpop.f32.mrb[2].mxu1 }
 0x1ba   :  { %v339_v41 = vadd.f32 %v810_v40, %v705_v35  ;;  %v330_v42 = vpop.f32.mrb[3].mxu1  ;;  %v392_v44 = vmax.f32 %v336_v37, 0.0 }
 0x1bb   :  { %v331_v43 = vadd.f32 %v705_v35, %v330_v42  ;;  %v390_v46 = vmax.f32 %v328_v39, 0.0 }
 0x1bc   :  { %v393_v45 = vmax.f32 %v339_v41, 0.0 }
 0x1bd   :  { %v391_v47 = vmax.f32 %v331_v43, 0.0 }
 0x1be   :  { %v407_v48 = vpack.c.bf16 %v393_v45, %v392_v44  ;;  %v920_v44 = vmov 0.0  }
 0x1bf   :  { %v406_v49 = vpack.c.bf16 %v391_v47, %v390_v46  ;;  %v813_v50 = vpop.f32.mrb[4].mxu1  ;;  %855 = vmatprep.subr.bf16.mxu1 %v920_v44  ;;  %871 = vmatprep.mubr.msk.bf16.mxu1 %vm921_vm2, %v920_v44 }
 0x1c0   :  { %v352_v51 = vadd.f32 %v813_v50, %v705_v35  ;;  %v343_v52 = vpop.f32.mrb[5].mxu1 }
 0x1c1   :  { %v344_v53 = vadd.f32 %v705_v35, %v343_v52  ;;  %v814_v54 = vpop.f32.mrb[6].mxu1  ;;  %839 = vmatprep.mubr.bf16.mxu0 %v406_v49 }
 0x1c2   :  { %v396_v55 = vmax.f32 %v352_v51, 0.0  ;;  %v355_v56 = vadd.f32 %v814_v54, %v705_v35  ;;  %v346_v57 = vpop.f32.mrb[7].mxu1  ;;  %840 = vmatmul.mubr.bf16.vlgmr.msra.gmra.mrb[16].mxu0 %v407_v48 }
 0x1c3   :  { %v394_v58 = vmax.f32 %v344_v53, 0.0  ;;  %v347_v59 = vadd.f32 %v705_v35, %v346_v57 }
 0x1c4   :  { %v397_v60 = vmax.f32 %v355_v56, 0.0 }
 0x1c5   :  { %v395_v61 = vmax.f32 %v347_v59, 0.0 }
 0x1c6   :  { %v409_v62 = vpack.c.bf16 %v397_v60, %v396_v55 }
 0x1c7   :  { %v408_v63 = vpack.c.bf16 %v395_v61, %v394_v58  ;;  %v817_v0 = vpop.f32.mrb[8].mxu1 }
 0x1c8   :  { %v368_v1 = vadd.f32 %v817_v0, %v705_v35  ;;  %v359_v2 = vpop.f32.mrb[9].mxu1 }
 0x1c9   :  { %843 = vmatprep.mubr.bf16.mxu0 %v408_v63  ;;  %v360_v3 = vadd.f32 %v705_v35, %v359_v2  ;;  %v818_v4 = vpop.f32.mrb[10].mxu1 }
 0x1ca   :  { %844 = vmatmul.mubr.bf16.gmra.mrb[20].mxu0 %v409_v62  ;;  %v400_v5 = vmax.f32 %v368_v1, 0.0  ;;  %v371_v6 = vadd.f32 %v818_v4, %v705_v35  ;;  %v362_v7 = vpop.f32.mrb[11].mxu1 }
 0x1cb   :  { %v398_v8 = vmax.f32 %v360_v3, 0.0  ;;  %v363_v9 = vadd.f32 %v705_v35, %v362_v7 }
 0x1cc   :  { %v401_v10 = vmax.f32 %v371_v6, 0.0 }
 0x1cd   :  { %v399_v11 = vmax.f32 %v363_v9, 0.0 }
 0x1ce   :  { %v411_v12 = vpack.c.bf16 %v401_v10, %v400_v5 }
 0x1cf   :  { %v410_v13 = vpack.c.bf16 %v399_v11, %v398_v8  ;;  %v821_v14 = vpop.f32.mrb[12].mxu1 }
 0x1d0   :  { %v384_v15 = vadd.f32 %v821_v14, %v705_v35  ;;  %v375_v16 = vpop.f32.mrb[13].mxu1 }
 0x1d1   :  { %847 = vmatprep.mubr.bf16.mxu0 %v410_v13  ;;  %v376_v17 = vadd.f32 %v705_v35, %v375_v16  ;;  %v822_v18 = vpop.f32.mrb[14].mxu1 }
 0x1d2   :  { %848 = vmatmul.mubr.bf16.gmra.mrb[24].mxu0 %v411_v12  ;;  %v404_v19 = vmax.f32 %v384_v15, 0.0  ;;  %v387_v20 = vadd.f32 %v822_v18, %v705_v35  ;;  %v378_v21 = vpop.f32.mrb[15].mxu1 }
 0x1d3   :  { %v402_v22 = vmax.f32 %v376_v17, 0.0  ;;  %v379_v23 = vadd.f32 %v705_v35, %v378_v21 }
 0x1d4   :  { %v405_v24 = vmax.f32 %v387_v20, 0.0 }
 0x1d5   :  { %v403_v25 = vmax.f32 %v379_v23, 0.0 }
 0x1d6   :  { %v413_v26 = vpack.c.bf16 %v405_v24, %v404_v19 }
 0x1d7   :  { %v412_v27 = vpack.c.bf16 %v403_v25, %v402_v22 }
 0x1d9   :  { %851 = vmatprep.mubr.bf16.mxu0 %v412_v27 }
 0x1da   :  { %852 = vmatmul.mubr.bf16.gmra.mrb[28].mxu0 %v413_v26 }
 0x295   :  { %v841_v29 = vpop.f32.mrb[16].mxu0 }
 0x296   :  { %v519_v30 = vpop.f32.mrb[17].mxu0  ;;  %v528_v36 = vadd.f32 %v841_v29, %v1089_v28 }
 0x297   :  { %v842_v31 = vpop.f32.mrb[18].mxu0  ;;  %v520_v32 = vadd.f32 %v1089_v28, %v519_v30 }
 0x298   :  { %v522_v33 = vpop.f32.mrb[19].mxu0  ;;  %v584_v42 = vmax.f32 %v528_v36, 0.0  ;;  %v531_v43 = vadd.f32 %v842_v31, %v1089_v28 }
 0x299   :  { %v523_v34 = vadd.f32 %v1089_v28, %v522_v33  ;;  %v582_v35 = vmax.f32 %v520_v32, 0.0 }
 0x29a   :  { %v585_v45 = vmax.f32 %v531_v43, 0.0 }
 0x29b   :  { %598 = vxpose.xlu0.b32.start [1/16] %v582_v35, 128  ;;  %v583_v37 = vmax.f32 %v523_v34, 0.0 }
 0x29d   :  { %v845_v38 = vpop.f32.mrb[20].mxu0 }
 0x29e   :  { %v535_v39 = vpop.f32.mrb[21].mxu0  ;;  %v544_v53 = vadd.f32 %v845_v38, %v1089_v28  ;;  %v638_v38 = vld [vmem:[%s1141_s7] sm:$0x1] }
 0x29f   :  { %v846_v40 = vpop.f32.mrb[22].mxu0  ;;  %599 = vxpose.xlu0.b32.cont [2/16] %v583_v37, 128  ;;  %v536_v46 = vadd.f32 %v1089_v28, %v535_v39  ;;  %v639_v39 = vld [vmem:[%s1142_s8] sm:$0x1] }
 0x2a0   :  { %v538_v41 = vpop.f32.mrb[23].mxu0  ;;  %v588_v59 = vmax.f32 %v544_v53, 0.0  ;;  %v547_v60 = vadd.f32 %v846_v40, %v1089_v28 }
 0x2a1   :  { %v586_v51 = vmax.f32 %v536_v46, 0.0  ;;  %v539_v52 = vadd.f32 %v1089_v28, %v538_v41 }
 0x2a2   :  { %v589_v61 = vmax.f32 %v547_v60, 0.0 }
 0x2a3   :  { %600 = vxpose.xlu0.b32.cont [3/16] %v584_v42, 128  ;;  %v587_v54 = vmax.f32 %v539_v52, 0.0 }
 0x2a5   :  { %v849_v47 = vpop.f32.mrb[24].mxu0 }
 0x2a6   :  { %v551_v48 = vpop.f32.mrb[25].mxu0  ;;  %v560_v1 = vadd.f32 %v849_v47, %v1089_v28 }
 0x2a7   :  { %601 = vxpose.xlu0.b32.cont [4/16] %v585_v45, 128  ;;  %v850_v49 = vpop.f32.mrb[26].mxu0  ;;  %v552_v62 = vadd.f32 %v1089_v28, %v551_v48 }
 0x2a8   :  { %v554_v50 = vpop.f32.mrb[27].mxu0  ;;  %v592_v3 = vmax.f32 %v560_v1, 0.0  ;;  %v563_v4 = vadd.f32 %v850_v49, %v1089_v28 }
 0x2a9   :  { %v590_v63 = vmax.f32 %v552_v62, 0.0  ;;  %v555_v0 = vadd.f32 %v1089_v28, %v554_v50 }
 0x2aa   :  { %v593_v5 = vmax.f32 %v563_v4, 0.0 }
 0x2ab   :  { %602 = vxpose.xlu0.b32.cont [5/16] %v586_v51, 128  ;;  %v591_v2 = vmax.f32 %v555_v0, 0.0 }
 0x2ad   :  { %v853_v55 = vpop.f32.mrb[28].mxu0 }
 0x2ae   :  { %v567_v56 = vpop.f32.mrb[29].mxu0  ;;  %v576_v9 = vadd.f32 %v853_v55, %v1089_v28 }
 0x2af   :  { %603 = vxpose.xlu0.b32.cont [6/16] %v587_v54, 128  ;;  %v854_v57 = vpop.f32.mrb[30].mxu0  ;;  %v568_v6 = vadd.f32 %v1089_v28, %v567_v56 }
 0x2b0   :  { %v570_v58 = vpop.f32.mrb[31].mxu0  ;;  %v596_v11 = vmax.f32 %v576_v9, 0.0  ;;  %v579_v12 = vadd.f32 %v854_v57, %v1089_v28 }
 0x2b1   :  { %v594_v7 = vmax.f32 %v568_v6, 0.0  ;;  %v571_v8 = vadd.f32 %v1089_v28, %v570_v58 }
 0x2b2   :  { %v597_v13 = vmax.f32 %v579_v12, 0.0 }
 0x2b3   :  { %604 = vxpose.xlu0.b32.cont [7/16] %v588_v59, 128  ;;  %v595_v10 = vmax.f32 %v571_v8, 0.0 }
 0x2b7   :  { %605 = vxpose.xlu0.b32.cont [8/16] %v589_v61, 128 }
 0x2bb   :  { %606 = vxpose.xlu0.b32.cont [9/16] %v590_v63, 128 }
 0x2bf   :  { %607 = vxpose.xlu0.b32.cont [10/16] %v591_v2, 128 }
 0x2c3   :  { %608 = vxpose.xlu0.b32.cont [11/16] %v592_v3, 128 }
 0x2c7   :  { %609 = vxpose.xlu0.b32.cont [12/16] %v593_v5, 128 }
 0x2cb   :  { %610 = vxpose.xlu0.b32.cont [13/16] %v594_v7, 128 }
 0x2cf   :  { %611 = vxpose.xlu0.b32.cont [14/16] %v595_v10, 128 }
 0x2d3   :  { %612 = vxpose.xlu0.b32.cont [15/16] %v596_v11, 128 }
 0x2d7   :  { %613 = vxpose.xlu0.b32.end [16/16] %v597_v13, 128 }
 0x31b   :  { %v614_v14 = vpop.trf.xlu0 }
 0x31f   :  { %v615_v15 = vpop.trf.xlu0 }
 0x320   :  { %v630_v16 = vpack.c.bf16 %v615_v15, %v614_v14 }
 0x322   :  { %856 = vmatpush3.bf16.msra.mxu1 %v630_v16 }
 0x323   :  { %v616_v17 = vpop.trf.xlu0  ;;  %857 = vmatprep.subr.bf16.mxu1 %v920_v44 }
 0x327   :  { %v617_v18 = vpop.trf.xlu0 }
 0x328   :  { %v631_v19 = vpack.c.bf16 %v617_v18, %v616_v17 }
 0x32a   :  { %858 = vmatpush3.bf16.msra.mxu1 %v631_v19 }
 0x32b   :  { %v618_v20 = vpop.trf.xlu0  ;;  %859 = vmatprep.subr.bf16.mxu1 %v920_v44 }
 0x32f   :  { %v619_v21 = vpop.trf.xlu0 }
 0x330   :  { %v632_v22 = vpack.c.bf16 %v619_v21, %v618_v20 }
 0x332   :  { %860 = vmatpush3.bf16.msra.mxu1 %v632_v22 }
 0x333   :  { %v620_v23 = vpop.trf.xlu0  ;;  %861 = vmatprep.subr.bf16.mxu1 %v920_v44 }
 0x337   :  { %v621_v24 = vpop.trf.xlu0 }
 0x338   :  { %v633_v25 = vpack.c.bf16 %v621_v24, %v620_v23 }
 0x33a   :  { %862 = vmatpush3.bf16.msra.mxu1 %v633_v25 }
 0x33b   :  { %v622_v26 = vpop.trf.xlu0  ;;  %863 = vmatprep.subr.bf16.mxu1 %v920_v44 }
 0x33f   :  { %v623_v27 = vpop.trf.xlu0 }
 0x340   :  { %v634_v28 = vpack.c.bf16 %v623_v27, %v622_v26 }
 0x342   :  { %864 = vmatpush3.bf16.msra.mxu1 %v634_v28 }
 0x343   :  { %v624_v29 = vpop.trf.xlu0  ;;  %865 = vmatprep.subr.bf16.mxu1 %v920_v44 }
 0x347   :  { %v625_v30 = vpop.trf.xlu0 }
 0x348   :  { %v635_v31 = vpack.c.bf16 %v625_v30, %v624_v29 }
 0x34a   :  { %866 = vmatpush3.bf16.msra.mxu1 %v635_v31 }
 0x34b   :  { %v626_v32 = vpop.trf.xlu0  ;;  %867 = vmatprep.subr.bf16.mxu1 %v920_v44 }
 0x34f   :  { %v627_v33 = vpop.trf.xlu0 }
 0x350   :  { %v636_v34 = vpack.c.bf16 %v627_v33, %v626_v32 }
 0x352   :  { %868 = vmatpush3.bf16.msra.mxu1 %v636_v34 }
 0x353   :  { %v628_v35 = vpop.trf.xlu0  ;;  %869 = vmatprep.subr.bf16.mxu1 %v920_v44 }
 0x357   :  { %v629_v36 = vpop.trf.xlu0 }
 0x358   :  { %v637_v37 = vpack.c.bf16 %v629_v36, %v628_v35 }
 0x35a   :  { %870 = vmatpush3.bf16.msra.mxu1 %v637_v37 }
 0x35d   :  { %872 = vmatmul.mubr.bf16.vlgmr.msra.gmra.mrb[16].mxu1 %v638_v38 }
 0x430   :  { %v674_v40 = vpop.f32.mrb[16].mxu1 }
 0x431   :  { %v675_v41 = vadd.f32 %v674_v40, %v639_v39  ;;  %v873_v42 = vpop.f32.mrb[17].mxu1 }
 0x432   :  { %v677_v43 = vpop.f32.mrb[18].mxu1 }
 0x433   :  { %680 = vst [vmem:[#allocation2] sm:$0x1] %v675_v41  ;;  %v874_v44 = vpop.f32.mrb[19].mxu1 }
 0x434   :  { %907 = shalt.err (!%p904_p4)
}
 0x435   :  { %s908_s8 = scalar_lea.hbm %s1143_s9, 16 }
 0x436   :  { %p909_p5 = scmp.ne.s32.totalorder %s1143_s9, %s908_s8  ;;  %p912_p6 = scmp.lt.u32.totalorder %s908_s8, %s1143_s9 }
 0x438   :  { %p914_p7 = pnand %p912_p6, %p909_p5 }
 0x43a   :  { %917 = shalt.err (!%p914_p7)
}
 0x43b   :  { %690 = dma.vmem_to_hbm [thread:$0]  %s688_s14, 16, %s1143_s9, [#allocation3]  }
 0x43c   :  { %918 = dma.done.wait [#allocation3], 16  }
 0x43d   :  { %919 = vsyncadd [#allocation3], 4294967280 }
 0x43e   :  { %694 = vsyncpa [#allocation3], 1 }

</bundles_post_ra>
